<compile_context>
chip_gen: v5e
topology: v5e:2x2
jax: 0.10.0
libtpu: 0.0.40
codegen_flags: <defaults>
</compile_context>

<pallas_src>
import functools

import jax
import jax.numpy as jnp
from jax.experimental import pallas as pl
from jax.experimental.pallas import tpu as pltpu

NUM_STRATEGIES = 2

# architecture constants of the reference module
H1 = 128   # strategy-net hidden 1
H2 = 64    # strategy-net hidden 2
HV = 32    # volatility-modulator hidden
HA = 64    # adaptive-weight-net hidden

PVEC_W = 128          # lane width of every packed-parameter row / weight block
SLAB_R = 8            # rows per packed-parameter slab (vreg-aligned sublane stride)

# lane layout of the "head block" (third 128-lane block of the layer-1 output)
HEAD_AD_OFF = 0               # adaptive-weight-net hidden   lanes [0, 64)
HEAD_V_OFF = HA               # volatility-modulator hidden  lanes [64, 96)
HEAD_ONE_OFF = HA + HV        # constant-1 bias-carrier lane (96)

# packed small-parameter slabs (each SLAB_R x 128; first S*B rows are live)
SLAB_GAMMA = 0                               # LN gamma, stacked per strategy row
SLAB_BETA = 1                                # LN beta
SLAB_B2 = 2                                  # layer-2 bias, stacked, lanes [0, H2)
SLAB_B3 = 3                                  # layer-3 bias, stacked, lanes [0, A)
SLAB_BASE = 4                                # softmax(base_amplitudes), lanes [0, S)
SLAB_AW2 = 5                                 # S slabs: adaptive head cols (+bias @ lane 96)
SLAB_VW2 = SLAB_AW2 + NUM_STRATEGIES         # S slabs: vol-mod head cols  (+bias @ lane 96)
SLAB_CORR = SLAB_VW2 + NUM_STRATEGIES        # S slabs: strategy_correlation rows, lanes [0, S)
N_SLABS = SLAB_CORR + NUM_STRATEGIES


# ----------------------------- in-kernel math helpers -----------------------------

def _erf(x):
    # Abramowitz & Stegun 7.1.26 (|err| < 1.5e-7): keeps torch.nn.GELU()'s exact-erf semantics
    # without a lax.erf Mosaic lowering.  Exact divide (not approx reciprocal) so the kernel
    # validates at 1e-3; VALU cost at (4,128) elements is negligible.
    a1, a2, a3, a4, a5 = 0.254829592, -0.284496736, 1.421413741, -1.453152027, 1.061405429
    p = 0.3275911
    sgn = jnp.where(x >= 0.0, 1.0, -1.0)
    ax = jnp.abs(x)
    t = 1.0 / (1.0 + p * ax)
    poly = ((((a5 * t + a4) * t + a3) * t + a2) * t + a1) * t
    return sgn * (1.0 - poly * jnp.exp(-ax * ax))


def _gelu(x):     # torch.nn.GELU() default (erf formulation)
    return 0.5 * x * (1.0 + _erf(x * 0.7071067811865476))


def _silu(x):     # "nn.Swish" in the reference == SiLU
    return x * jax.nn.sigmoid(x)


def _layernorm(x, gamma, beta, eps=1e-5):
    mu = jnp.mean(x, axis=-1, keepdims=True)
    xc = x - mu
    var = jnp.mean(xc * xc, axis=-1, keepdims=True)
    return xc * jax.lax.rsqrt(var + eps) * gamma + beta


def _softmax(x):
    # last-dim softmax with an EXACT divide (correctness review: the four chained softmaxes
    # must not compound approximate-reciprocal error); the arrays are (4, 2), so cost is nil.
    m = jnp.max(x, axis=-1, keepdims=True)
    e = jnp.exp(x - m)
    return e / jnp.sum(e, axis=-1, keepdims=True)


# ----------------------------------- kernel ----------------------------------------

def _superposition_kernel(x_ref, pvec_ref, w1_ref, w2_ref, w3_ref, out_ref):
    SB = x_ref.shape[0]                      # stacked rows: r = j*B + b  (strategy j, batch b)
    S = NUM_STRATEGIES
    B = SB // S
    A = (out_ref.shape[-1] - S * S) // S

    def slab(i):                             # (SB, 128) packed-parameter slab, vreg-aligned
        return pvec_ref[i * SLAB_R:i * SLAB_R + SB, :]

    # per-row strategy mask: rows [0, B) -> trend, rows [B, 2B) -> mean-reversion
    row = jax.lax.broadcasted_iota(jnp.int32, (SB, PVEC_W), 0)
    is_trend = row < B

    # ---- layer 1 (+ adaptive-net l1 + vol-modulator l1 + all their biases): ONE MXU pass ----
    h1 = jnp.dot(x_ref[...], w1_ref[...], preferred_element_type=jnp.float32)   # (SB, 384)

    # per-strategy block / activation select on full stacked rows (one vreg each, no relayout)
    act1 = jnp.where(is_trend, _gelu(h1[:, 0:H1]), _silu(h1[:, H1:2 * H1]))      # (SB, 128)
    h_ln = _layernorm(act1, slab(SLAB_GAMMA), slab(SLAB_BETA))

    # head block: relu([adaptive hidden | vol-mod hidden | 1 | zeros]) — one aligned vreg slice
    hblk = jnp.maximum(h1[:, 2 * H1:2 * H1 + PVEC_W], 0.0)                       # (SB, 128)

    # ---- strategy layer 2: ONE (SB,128)@(128,256) MXU pass, 128-lane-aligned blocks ----
    r2 = jnp.dot(h_ln, w2_ref[...], preferred_element_type=jnp.float32)          # (SB, 256)
    pre2 = jnp.where(is_trend, r2[:, 0:PVEC_W], r2[:, PVEC_W:2 * PVEC_W]) + slab(SLAB_B2)
    act2 = jnp.where(is_trend, _gelu(pre2), _silu(pre2))       # (SB,128); lanes [H2,128) stay 0

    # ---- strategy layer 3: ONE (SB,128)@(128,256) MXU pass ----
    r3 = jnp.dot(act2, w3_ref[...], preferred_element_type=jnp.float32)          # (SB, 256)
    pre3 = jnp.where(is_trend, r3[:, 0:PVEC_W], r3[:, PVEC_W:2 * PVEC_W]) + slab(SLAB_B3)
    y = jnp.tanh(pre3) * jnp.where(is_trend, 1.2, -0.8)        # y[j*B+b, :A] = strategy[b, j, :]

    # ---- S-wide heads: VPU multiply + lane-reduce; bias rides on the constant-1 lane ----
    def head(slab0):
        cols = [jnp.sum(hblk * slab(slab0 + k), axis=-1, keepdims=True) for k in range(S)]
        return jnp.concatenate(cols, axis=-1)                                    # (SB, S)

    adaptive = _softmax(head(SLAB_AW2))
    vol_factor = jax.nn.sigmoid(head(SLAB_VW2))

    combined = _softmax(slab(SLAB_BASE)[:, 0:S] * vol_factor * adaptive)         # (SB, S)
    # combined @ strategy_correlation, unrolled as S broadcast-FMAs (cheaper than an MXU push
    # for a 2-wide contraction, and avoids small-array relayouts)
    ca = combined[:, 0:1] * slab(SLAB_CORR)[:, 0:S]
    for j in range(1, S):
        ca = ca + combined[:, j:j + 1] * slab(SLAB_CORR + j)[:, 0:S]
    w_st = _softmax(ca)          # w_st[j*B+b, k] == correlation_adjusted_weights[b, j, k]

    # ---- superposition (reproduces the reference broadcast, which needs batch == S) ----
    # superposed[b, k, :] = sum_j w_st[j*B+b, k] * y[k*B+j, :A]
    pieces = []
    for k in range(S):
        acc = w_st[0:B, k:k + 1] * y[k * B:k * B + 1, :]
        for j in range(1, S):
            acc = acc + w_st[j * B:(j + 1) * B, k:k + 1] * y[k * B + j:k * B + j + 1, :]
        pieces.append(acc[:, 0:A])
    # merged output: [superposed (S*A) | correlation-adjusted weights (S*S)], single store
    pieces += [w_st[j * B:(j + 1) * B, :] for j in range(S)]
    out_ref[...] = jnp.concatenate(pieces, axis=-1)                              # (B, S*A+S*S)


# -------------------------------- host-side packing ---------------------------------

def init_params(key, state_dim, action_dim, num_strategies=NUM_STRATEGIES):
    """Deterministic synthetic init mirroring the PyTorch module's parameter shapes.
    Linear weights stored (in_features, out_features); 1-D params as (1, N) rows."""
    def linear(k, fan_in, fan_out):
        k1, k2 = jax.random.split(k)
        bound = fan_in ** -0.5
        w = jax.random.uniform(k1, (fan_in, fan_out), jnp.float32, -bound, bound)
        b = jax.random.uniform(k2, (1, fan_out), jnp.float32, -bound, bound)
        return w, b

    keys = jax.random.split(key, 10)
    p = {}
    # TrendFollowing: Linear(D,128) GELU LN(128) Linear(128,64) GELU Linear(64,A) Tanh
    p['t_w1'], p['t_b1'] = linear(keys[0], state_dim, H1)
    p['t_g'] = jnp.ones((1, H1), jnp.float32)
    p['t_bt'] = jnp.zeros((1, H1), jnp.float32)
    p['t_w2'], p['t_b2'] = linear(keys[1], H1, H2)
    p['t_w3'], p['t_b3'] = linear(keys[2], H2, action_dim)
    # MeanReversion: Linear(D,128) SiLU LN(128) Linear(128,64) SiLU Linear(64,A) Tanh
    p['m_w1'], p['m_b1'] = linear(keys[3], state_dim, H1)
    p['m_g'] = jnp.ones((1, H1), jnp.float32)
    p['m_bt'] = jnp.zeros((1, H1), jnp.float32)
    p['m_w2'], p['m_b2'] = linear(keys[4], H1, H2)
    p['m_w3'], p['m_b3'] = linear(keys[5], H2, action_dim)
    # base_amplitudes = ones(S)/S
    p['base_amp'] = jnp.full((1, num_strategies), 1.0 / num_strategies, jnp.float32)
    # volatility modulator: Linear(1,32) ReLU Linear(32,S) Sigmoid
    p['v_w1'], p['v_b1'] = linear(keys[6], 1, HV)
    p['v_w2'], p['v_b2'] = linear(keys[7], HV, num_strategies)
    # adaptive weight net: Linear(D+1,64) ReLU Linear(64,S) Softmax
    a_w1, p['a_b1'] = linear(keys[8], state_dim + 1, HA)
    p['a_w1s'] = a_w1[:state_dim, :]          # state columns of the weight
    p['a_w1v'] = a_w1[state_dim:, :]          # (1, 64) volatility column
    p['a_w2'], p['a_b2'] = linear(keys[9], HA, num_strategies)
    # strategy_correlation = eye(S) * 0.1
    p['corr'] = jnp.eye(num_strategies, dtype=jnp.float32) * 0.1
    return p


def pack_params(p):
    """One-time packing of module parameters into the kernel's 4 operands (not per-call).

    * pvec   : (N_SLABS*8, 128)  pre-duplicated stacked parameter slabs (no in-kernel broadcasts)
    * w1_aug : (Kp, 384)  rows [state | vol | 1 | 0pad];  cols [trend_w1 | meanrev_w1 | head blk]
               (head blk = adaptive_w1_state @0:64, vol_w1 @64:96, bias-carrier lane @96)
    * w2_cat : (128, 256) [trend_w2 | 0 | meanrev_w2 | 0]   (128-lane-aligned blocks)
    * w3_cat : (128, 256) [trend_w3 | 0 | meanrev_w3 | 0]
    """
    S = NUM_STRATEGIES
    B = S                                        # reference broadcast requires batch == S
    SB = S * B
    A = p['t_w3'].shape[1]
    D = p['t_w1'].shape[0]
    assert A <= PVEC_W and SB <= SLAB_R
    f32 = jnp.float32

    def lane_pad(v, off=0):
        v = jnp.asarray(v, f32).reshape(-1)
        return jnp.zeros((PVEC_W,), f32).at[off:off + v.shape[0]].set(v)

    def stacked_slab(per_strategy_rows):         # row j duplicated over its B batch rows
        rows = [per_strategy_rows[j] for j in range(S) for _ in range(B)]
        rows += [jnp.zeros((PVEC_W,), f32)] * (SLAB_R - SB)
        return jnp.stack(rows, axis=0)

    def const_slab(r):
        rows = [r] * SB + [jnp.zeros((PVEC_W,), f32)] * (SLAB_R - SB)
        return jnp.stack(rows, axis=0)

    slabs = [None] * N_SLABS
    slabs[SLAB_GAMMA] = stacked_slab([lane_pad(p['t_g']), lane_pad(p['m_g'])])
    slabs[SLAB_BETA] = stacked_slab([lane_pad(p['t_bt']), lane_pad(p['m_bt'])])
    slabs[SLAB_B2] = stacked_slab([lane_pad(p['t_b2']), lane_pad(p['m_b2'])])
    slabs[SLAB_B3] = stacked_slab([lane_pad(p['t_b3']), lane_pad(p['m_b3'])])
    # base_amplitudes softmax is a parameter-only op: constant-folded host-side once
    slabs[SLAB_BASE] = const_slab(lane_pad(jax.nn.softmax(p['base_amp'].reshape(-1))))
    for k in range(S):
        aw = lane_pad(p['a_w2'][:, k], HEAD_AD_OFF).at[HEAD_ONE_OFF].set(p['a_b2'].reshape(-1)[k])
        vw = lane_pad(p['v_w2'][:, k], HEAD_V_OFF).at[HEAD_ONE_OFF].set(p['v_b2'].reshape(-1)[k])
        slabs[SLAB_AW2 + k] = const_slab(aw)
        slabs[SLAB_VW2 + k] = const_slab(vw)
    for j in range(S):
        slabs[SLAB_CORR + j] = const_slab(lane_pad(p['corr'][j, :]))
    pvec = jnp.concatenate(slabs, axis=0)                                   # (88, 128)

    HEAD = 2 * H1                                 # head block starts at a 128-lane boundary
    W1W = 2 * H1 + PVEC_W                         # 384
    KP = ((D + 2 + 7) // 8) * 8                   # explicit zero-pad of the contraction dim
    w1 = jnp.zeros((KP, W1W), f32)
    w1 = w1.at[0:D, 0:H1].set(p['t_w1'])
    w1 = w1.at[0:D, H1:2 * H1].set(p['m_w1'])
    w1 = w1.at[0:D, HEAD:HEAD + HA].set(p['a_w1s'])
    w1 = w1.at[D, HEAD:HEAD + HA].set(p['a_w1v'].reshape(-1))               # vol column (adaptive)
    w1 = w1.at[D, HEAD + HEAD_V_OFF:HEAD + HEAD_V_OFF + HV].set(p['v_w1'].reshape(-1))
    w1 = w1.at[D + 1, 0:H1].set(p['t_b1'].reshape(-1))                      # biases ride the
    w1 = w1.at[D + 1, H1:2 * H1].set(p['m_b1'].reshape(-1))                 # constant-1 column
    w1 = w1.at[D + 1, HEAD:HEAD + HA].set(p['a_b1'].reshape(-1))
    w1 = w1.at[D + 1, HEAD + HEAD_V_OFF:HEAD + HEAD_V_OFF + HV].set(p['v_b1'].reshape(-1))
    w1 = w1.at[D + 1, HEAD + HEAD_ONE_OFF].set(1.0)                         # head bias carrier

    w2 = jnp.zeros((H1, 2 * PVEC_W), f32)                                   # (128, 256)
    w2 = w2.at[:, 0:H2].set(p['t_w2'])
    w2 = w2.at[:, PVEC_W:PVEC_W + H2].set(p['m_w2'])

    w3 = jnp.zeros((PVEC_W, 2 * PVEC_W), f32)                               # (128, 256)
    w3 = w3.at[0:H2, 0:A].set(p['t_w3'])
    w3 = w3.at[0:H2, PVEC_W:PVEC_W + A].set(p['m_w3'])

    return pvec, w1, w2, w3


# -------------------------------- host-side wrapper ---------------------------------

@functools.partial(jax.jit, static_argnames=("action_dim",))
def strategy_superposition(state, volatility, packed, *, action_dim):
    """Returns (superposed_output [B,S,A], correlation_adjusted_weights [B,S,S])."""
    pvec, w1_aug, w2_cat, w3_cat = packed
    B, S, D = state.shape
    assert S == NUM_STRATEGIES
    assert B == S, "the reference module's final broadcast requires batch == num_strategies"
    A = action_dim
    SB = S * B
    KP = w1_aug.shape[0]

    # wrapper-side layout plumbing (a few hundred bytes, XLA-side): slot-stacked rows,
    # volatility column and constant-1 bias-carrier column, padded to the weight's K.
    state_st = jnp.transpose(state, (1, 0, 2)).reshape(SB, D).astype(jnp.float32)
    vol_st = jnp.tile(volatility.astype(jnp.float32), (S, 1))
    ones = jnp.ones((SB, 1), jnp.float32)
    pad = jnp.zeros((SB, KP - (D + 2)), jnp.float32)
    x_aug = jnp.concatenate([state_st, vol_st, ones, pad], axis=-1)          # (SB, KP)

    out_w = S * A + S * S
    cost = pl.CostEstimate(
        flops=2 * SB * (KP * w1_aug.shape[1] + H1 * w2_cat.shape[1] + PVEC_W * w3_cat.shape[1])
              + 32 * SB * PVEC_W,
        transcendentals=8 * SB * PVEC_W,
        bytes_accessed=4 * (x_aug.size + pvec.size + w1_aug.size + w2_cat.size + w3_cat.size
                            + B * out_w))

    vmem = lambda: pl.BlockSpec(memory_space=pltpu.MemorySpace.VMEM)
    # single invocation, no grid: at B == S == 2 a batch grid / megacore split is pure overhead
    out_flat = pl.pallas_call(
        _superposition_kernel,
        out_shape=jax.ShapeDtypeStruct((B, out_w), jnp.float32),
        in_specs=[vmem() for _ in range(5)],
        out_specs=vmem(),
        cost_estimate=cost,
    )(x_aug, pvec, w1_aug, w2_cat, w3_cat)

    # trailing-dim splits only (XLA-side, no transposes/copies of note)
    superposed = out_flat[:, :S * A].reshape(B, S, A)
    weights = out_flat[:, S * A:].reshape(B, S, S)
    return superposed, weights


# ------------------------- plain-JAX reference (for checking) -----------------------

def reference_forward(state, vol, p):
    """Plain-JAX replica of the PyTorch forward (including its broadcast quirk)."""
    B, S, _ = state.shape
    gelu = lambda x: jax.nn.gelu(x, approximate=False)
    silu = jax.nn.silu

    def ln(h, g, b):
        mu = jnp.mean(h, -1, keepdims=True)
        var = jnp.mean((h - mu) ** 2, -1, keepdims=True)
        return (h - mu) / jnp.sqrt(var + 1e-5) * g + b

    def mlp(x, q, act):
        h = act(x @ p[q + '_w1'] + p[q + '_b1'])
        h = ln(h, p[q + '_g'], p[q + '_bt'])
        h = act(h @ p[q + '_w2'] + p[q + '_b2'])
        return jnp.tanh(h @ p[q + '_w3'] + p[q + '_b3'])

    strategy_tensor = jnp.stack(
        [1.2 * mlp(state[:, 0, :], 't', gelu), -0.8 * mlp(state[:, 1, :], 'm', silu)], axis=1)

    base_amps = jax.nn.softmax(p['base_amp'][0])
    hv = jnp.maximum(vol @ p['v_w1'] + p['v_b1'], 0.0)
    vol_factor = jax.nn.sigmoid(hv @ p['v_w2'] + p['v_b2'])                   # (B, S)
    a_w1 = jnp.concatenate([p['a_w1s'], p['a_w1v']], axis=0)
    sv = jnp.concatenate([state, jnp.broadcast_to(vol[:, None, :], (B, S, 1))], axis=-1)
    ha = jnp.maximum(sv @ a_w1 + p['a_b1'], 0.0)
    adaptive = jax.nn.softmax(ha @ p['a_w2'] + p['a_b2'], axis=-1)            # (B, S, S)
    combined = jax.nn.softmax(
        base_amps[None, None, :] * vol_factor[:, None, :] * adaptive, axis=-1)
    ca = jax.nn.softmax(combined @ p['corr'], axis=-1)                        # (B, S, S)
    superposed = jnp.sum(strategy_tensor[None, :, :, :] * ca[:, :, :, None], axis=1)
    return superposed, ca


if __name__ == "__main__":
    key = jax.random.PRNGKey(0)
    k_state, k_vol, k_params = jax.random.split(key, 3)

    batch = NUM_STRATEGIES            # reference broadcast requires batch == num_strategies
    state_dim, action_dim = 32, 8

    params = init_params(k_params, state_dim, action_dim)
    packed = pack_params(params)      # one-time packing; not on the per-call path

    state = jax.random.normal(k_state, (batch, NUM_STRATEGIES, state_dim), jnp.float32)
    volatility = jax.random.uniform(k_vol, (batch, 1), jnp.float32)

    superposed, weights = strategy_superposition(state, volatility, packed,
                                                 action_dim=action_dim)
    jax.block_until_ready((superposed, weights))

    assert superposed.shape == (batch, NUM_STRATEGIES, action_dim)
    assert weights.shape == (batch, NUM_STRATEGIES, NUM_STRATEGIES)
    assert bool(jnp.all(jnp.isfinite(superposed))) and bool(jnp.all(jnp.isfinite(weights)))

    # correctness vs. the plain-JAX replica of the PyTorch forward.  Exact softmax divides +
    # f32 weights allow a 20x tighter tolerance than before (erf polynomial error < 1.5e-7;
    # remaining slack covers Mosaic-vs-XLA transcendental differences).
    ref_out, ref_w = reference_forward(state, volatility, params)
    assert bool(jnp.allclose(superposed, ref_out, rtol=1e-3, atol=1e-3))
    assert bool(jnp.allclose(weights, ref_w, rtol=1e-3, atol=1e-3))

    print("KERNEL_OK")
</pallas_src>

<mosaic_0001>
module attributes {stable_mosaic.version = 11 : i64} {
  func.func @_superposition_kernel(%arg0: memref<4x40xf32, #tpu.memory_space<vmem>>, %arg1: memref<88x128xf32, #tpu.memory_space<vmem>>, %arg2: memref<40x384xf32, #tpu.memory_space<vmem>>, %arg3: memref<128x256xf32, #tpu.memory_space<vmem>>, %arg4: memref<128x256xf32, #tpu.memory_space<vmem>>, %arg5: memref<2x20xf32, #tpu.memory_space<vmem>>) attributes {dimension_semantics = [], scalar_prefetch = 0 : i64, scratch_operands = 0 : i64, tpu.core_type = #tpu.core_type<tc>} {
    %0 = tpu.iota {dimensions = array<i32: 0>} : vector<4x128xi32>
    %c2_i32 = arith.constant 2 : i32
    %1 = vector.broadcast %c2_i32 : i32 to vector<4x128xi32>
    %2 = arith.cmpi slt, %0, %1 : vector<4x128xi32>
    %c0 = arith.constant 0 : index
    %c0_0 = arith.constant 0 : index
    %3 = vector.load %arg0[%c0, %c0_0] : memref<4x40xf32, #tpu.memory_space<vmem>>, vector<4x40xf32>
    %c0_1 = arith.constant 0 : index
    %c0_2 = arith.constant 0 : index
    %4 = vector.load %arg2[%c0_1, %c0_2] : memref<40x384xf32, #tpu.memory_space<vmem>>, vector<40x384xf32>
    %cst = arith.constant dense<0.000000e+00> : vector<4x384xf32>
    %5 = tpu.matmul %3, %4, %cst {dimension_numbers = #tpu.dot_dimension_numbers<[1], [0], [0], [1], [0, 0, 1, 1], [], []>} : vector<4x40xf32>, vector<40x384xf32>, vector<4x384xf32> -> vector<4x384xf32>
    %6 = vector.extract_strided_slice %5 {offsets = [0, 0], sizes = [4, 128], strides = [1, 1]} : vector<4x384xf32> to vector<4x128xf32>
    %cst_3 = arith.constant 5.000000e-01 : f32
    %7 = vector.broadcast %cst_3 : f32 to vector<4x128xf32>
    %8 = arith.mulf %7, %6 : vector<4x128xf32>
    %cst_4 = arith.constant 0.707106769 : f32
    %9 = vector.broadcast %cst_4 : f32 to vector<4x128xf32>
    %10 = arith.mulf %6, %9 : vector<4x128xf32>
    %cst_5 = arith.constant 0.000000e+00 : f32
    %11 = vector.broadcast %cst_5 : f32 to vector<4x128xf32>
    %12 = arith.cmpf oge, %10, %11 : vector<4x128xf32>
    %cst_6 = arith.constant 1.000000e+00 : f32
    %cst_7 = arith.constant -1.000000e+00 : f32
    %13 = vector.broadcast %cst_6 : f32 to vector<4x128xf32>
    %14 = vector.broadcast %cst_7 : f32 to vector<4x128xf32>
    %15 = arith.select %12, %13, %14 : vector<4x128xi1>, vector<4x128xf32>
    %16 = math.absf %10 : vector<4x128xf32>
    %cst_8 = arith.constant 0.327591091 : f32
    %17 = vector.broadcast %cst_8 : f32 to vector<4x128xf32>
    %18 = arith.mulf %17, %16 : vector<4x128xf32>
    %cst_9 = arith.constant 1.000000e+00 : f32
    %19 = vector.broadcast %cst_9 : f32 to vector<4x128xf32>
    %20 = arith.addf %19, %18 : vector<4x128xf32>
    %cst_10 = arith.constant 1.000000e+00 : f32
    %21 = vector.broadcast %cst_10 : f32 to vector<4x128xf32>
    %22 = arith.divf %21, %20 : vector<4x128xf32>
    %cst_11 = arith.constant 1.06140542 : f32
    %23 = vector.broadcast %cst_11 : f32 to vector<4x128xf32>
    %24 = arith.mulf %23, %22 : vector<4x128xf32>
    %cst_12 = arith.constant -1.45315206 : f32
    %25 = vector.broadcast %cst_12 : f32 to vector<4x128xf32>
    %26 = arith.addf %24, %25 : vector<4x128xf32>
    %27 = arith.mulf %26, %22 : vector<4x128xf32>
    %cst_13 = arith.constant 1.42141378 : f32
    %28 = vector.broadcast %cst_13 : f32 to vector<4x128xf32>
    %29 = arith.addf %27, %28 : vector<4x128xf32>
    %30 = arith.mulf %29, %22 : vector<4x128xf32>
    %cst_14 = arith.constant -0.284496725 : f32
    %31 = vector.broadcast %cst_14 : f32 to vector<4x128xf32>
    %32 = arith.addf %30, %31 : vector<4x128xf32>
    %33 = arith.mulf %32, %22 : vector<4x128xf32>
    %cst_15 = arith.constant 0.254829586 : f32
    %34 = vector.broadcast %cst_15 : f32 to vector<4x128xf32>
    %35 = arith.addf %33, %34 : vector<4x128xf32>
    %36 = arith.mulf %35, %22 : vector<4x128xf32>
    %cst_16 = arith.constant 0.000000e+00 : f32
    %37 = vector.broadcast %cst_16 : f32 to vector<4x128xf32>
    %38 = arith.subf %37, %16 : vector<4x128xf32>
    %39 = arith.mulf %38, %16 : vector<4x128xf32>
    %40 = math.exp %39 : vector<4x128xf32>
    %41 = arith.mulf %36, %40 : vector<4x128xf32>
    %cst_17 = arith.constant 1.000000e+00 : f32
    %42 = vector.broadcast %cst_17 : f32 to vector<4x128xf32>
    %43 = arith.subf %42, %41 : vector<4x128xf32>
    %44 = arith.mulf %15, %43 : vector<4x128xf32>
    %cst_18 = arith.constant 1.000000e+00 : f32
    %45 = vector.broadcast %cst_18 : f32 to vector<4x128xf32>
    %46 = arith.addf %45, %44 : vector<4x128xf32>
    %47 = arith.mulf %8, %46 : vector<4x128xf32>
    %48 = vector.extract_strided_slice %5 {offsets = [0, 128], sizes = [4, 128], strides = [1, 1]} : vector<4x384xf32> to vector<4x128xf32>
    %49 = arith.negf %48 : vector<4x128xf32>
    %50 = math.exp %49 : vector<4x128xf32>
    %cst_19 = arith.constant 1.000000e+00 : f32
    %51 = vector.broadcast %cst_19 : f32 to vector<4x128xf32>
    %52 = arith.addf %51, %50 : vector<4x128xf32>
    %53 = arith.divf %51, %52 : vector<4x128xf32>
    %54 = arith.mulf %48, %53 : vector<4x128xf32>
    %55 = arith.select %2, %47, %54 : vector<4x128xi1>, vector<4x128xf32>
    %c0_20 = arith.constant 0 : index
    %c0_21 = arith.constant 0 : index
    %56 = vector.load %arg1[%c0_20, %c0_21] : memref<88x128xf32, #tpu.memory_space<vmem>>, vector<4x128xf32>
    %c8 = arith.constant 8 : index
    %c0_22 = arith.constant 0 : index
    %57 = vector.load %arg1[%c8, %c0_22] : memref<88x128xf32, #tpu.memory_space<vmem>>, vector<4x128xf32>
    %cst_23 = arith.constant dense<0.000000e+00> : vector<4xf32>
    %58 = vector.multi_reduction <add>, %55, %cst_23 [1] : vector<4x128xf32> to vector<4xf32>
    %59 = vector.shape_cast %58 : vector<4xf32> to vector<4x1xf32>
    %cst_24 = arith.constant 1.280000e+02 : f32
    %60 = vector.broadcast %cst_24 : f32 to vector<4x1xf32>
    %61 = arith.divf %59, %60 : vector<4x1xf32>
    %62 = vector.broadcast %61 : vector<4x1xf32> to vector<4x128xf32>
    %63 = arith.subf %55, %62 : vector<4x128xf32>
    %64 = arith.mulf %63, %63 : vector<4x128xf32>
    %cst_25 = arith.constant dense<0.000000e+00> : vector<4xf32>
    %65 = vector.multi_reduction <add>, %64, %cst_25 [1] : vector<4x128xf32> to vector<4xf32>
    %66 = vector.shape_cast %65 : vector<4xf32> to vector<4x1xf32>
    %cst_26 = arith.constant 1.280000e+02 : f32
    %67 = vector.broadcast %cst_26 : f32 to vector<4x1xf32>
    %68 = arith.divf %66, %67 : vector<4x1xf32>
    %cst_27 = arith.constant 9.99999974E-6 : f32
    %69 = vector.broadcast %cst_27 : f32 to vector<4x1xf32>
    %70 = arith.addf %68, %69 : vector<4x1xf32>
    %71 = math.rsqrt %70 : vector<4x1xf32>
    %72 = vector.broadcast %71 : vector<4x1xf32> to vector<4x128xf32>
    %73 = arith.mulf %63, %72 : vector<4x128xf32>
    %74 = arith.mulf %73, %56 : vector<4x128xf32>
    %75 = arith.addf %74, %57 : vector<4x128xf32>
    %76 = vector.extract_strided_slice %5 {offsets = [0, 256], sizes = [4, 128], strides = [1, 1]} : vector<4x384xf32> to vector<4x128xf32>
    %cst_28 = arith.constant 0.000000e+00 : f32
    %77 = vector.broadcast %cst_28 : f32 to vector<4x128xf32>
    %78 = arith.maximumf %76, %77 : vector<4x128xf32>
    %c0_29 = arith.constant 0 : index
    %c0_30 = arith.constant 0 : index
    %79 = vector.load %arg3[%c0_29, %c0_30] : memref<128x256xf32, #tpu.memory_space<vmem>>, vector<128x256xf32>
    %cst_31 = arith.constant dense<0.000000e+00> : vector<4x256xf32>
    %80 = tpu.matmul %75, %79, %cst_31 {dimension_numbers = #tpu.dot_dimension_numbers<[1], [0], [0], [1], [0, 0, 1, 1], [], []>} : vector<4x128xf32>, vector<128x256xf32>, vector<4x256xf32> -> vector<4x256xf32>
    %81 = vector.extract_strided_slice %80 {offsets = [0, 0], sizes = [4, 128], strides = [1, 1]} : vector<4x256xf32> to vector<4x128xf32>
    %82 = vector.extract_strided_slice %80 {offsets = [0, 128], sizes = [4, 128], strides = [1, 1]} : vector<4x256xf32> to vector<4x128xf32>
    %83 = arith.select %2, %81, %82 : vector<4x128xi1>, vector<4x128xf32>
    %c16 = arith.constant 16 : index
    %c0_32 = arith.constant 0 : index
    %84 = vector.load %arg1[%c16, %c0_32] : memref<88x128xf32, #tpu.memory_space<vmem>>, vector<4x128xf32>
    %85 = arith.addf %83, %84 : vector<4x128xf32>
    %cst_33 = arith.constant 5.000000e-01 : f32
    %86 = vector.broadcast %cst_33 : f32 to vector<4x128xf32>
    %87 = arith.mulf %86, %85 : vector<4x128xf32>
    %cst_34 = arith.constant 0.707106769 : f32
    %88 = vector.broadcast %cst_34 : f32 to vector<4x128xf32>
    %89 = arith.mulf %85, %88 : vector<4x128xf32>
    %cst_35 = arith.constant 0.000000e+00 : f32
    %90 = vector.broadcast %cst_35 : f32 to vector<4x128xf32>
    %91 = arith.cmpf oge, %89, %90 : vector<4x128xf32>
    %cst_36 = arith.constant 1.000000e+00 : f32
    %cst_37 = arith.constant -1.000000e+00 : f32
    %92 = vector.broadcast %cst_36 : f32 to vector<4x128xf32>
    %93 = vector.broadcast %cst_37 : f32 to vector<4x128xf32>
    %94 = arith.select %91, %92, %93 : vector<4x128xi1>, vector<4x128xf32>
    %95 = math.absf %89 : vector<4x128xf32>
    %cst_38 = arith.constant 0.327591091 : f32
    %96 = vector.broadcast %cst_38 : f32 to vector<4x128xf32>
    %97 = arith.mulf %96, %95 : vector<4x128xf32>
    %cst_39 = arith.constant 1.000000e+00 : f32
    %98 = vector.broadcast %cst_39 : f32 to vector<4x128xf32>
    %99 = arith.addf %98, %97 : vector<4x128xf32>
    %cst_40 = arith.constant 1.000000e+00 : f32
    %100 = vector.broadcast %cst_40 : f32 to vector<4x128xf32>
    %101 = arith.divf %100, %99 : vector<4x128xf32>
    %cst_41 = arith.constant 1.06140542 : f32
    %102 = vector.broadcast %cst_41 : f32 to vector<4x128xf32>
    %103 = arith.mulf %102, %101 : vector<4x128xf32>
    %cst_42 = arith.constant -1.45315206 : f32
    %104 = vector.broadcast %cst_42 : f32 to vector<4x128xf32>
    %105 = arith.addf %103, %104 : vector<4x128xf32>
    %106 = arith.mulf %105, %101 : vector<4x128xf32>
    %cst_43 = arith.constant 1.42141378 : f32
    %107 = vector.broadcast %cst_43 : f32 to vector<4x128xf32>
    %108 = arith.addf %106, %107 : vector<4x128xf32>
    %109 = arith.mulf %108, %101 : vector<4x128xf32>
    %cst_44 = arith.constant -0.284496725 : f32
    %110 = vector.broadcast %cst_44 : f32 to vector<4x128xf32>
    %111 = arith.addf %109, %110 : vector<4x128xf32>
    %112 = arith.mulf %111, %101 : vector<4x128xf32>
    %cst_45 = arith.constant 0.254829586 : f32
    %113 = vector.broadcast %cst_45 : f32 to vector<4x128xf32>
    %114 = arith.addf %112, %113 : vector<4x128xf32>
    %115 = arith.mulf %114, %101 : vector<4x128xf32>
    %cst_46 = arith.constant 0.000000e+00 : f32
    %116 = vector.broadcast %cst_46 : f32 to vector<4x128xf32>
    %117 = arith.subf %116, %95 : vector<4x128xf32>
    %118 = arith.mulf %117, %95 : vector<4x128xf32>
    %119 = math.exp %118 : vector<4x128xf32>
    %120 = arith.mulf %115, %119 : vector<4x128xf32>
    %cst_47 = arith.constant 1.000000e+00 : f32
    %121 = vector.broadcast %cst_47 : f32 to vector<4x128xf32>
    %122 = arith.subf %121, %120 : vector<4x128xf32>
    %123 = arith.mulf %94, %122 : vector<4x128xf32>
    %cst_48 = arith.constant 1.000000e+00 : f32
    %124 = vector.broadcast %cst_48 : f32 to vector<4x128xf32>
    %125 = arith.addf %124, %123 : vector<4x128xf32>
    %126 = arith.mulf %87, %125 : vector<4x128xf32>
    %127 = arith.negf %85 : vector<4x128xf32>
    %128 = math.exp %127 : vector<4x128xf32>
    %cst_49 = arith.constant 1.000000e+00 : f32
    %129 = vector.broadcast %cst_49 : f32 to vector<4x128xf32>
    %130 = arith.addf %129, %128 : vector<4x128xf32>
    %131 = arith.divf %129, %130 : vector<4x128xf32>
    %132 = arith.mulf %85, %131 : vector<4x128xf32>
    %133 = arith.select %2, %126, %132 : vector<4x128xi1>, vector<4x128xf32>
    %c0_50 = arith.constant 0 : index
    %c0_51 = arith.constant 0 : index
    %134 = vector.load %arg4[%c0_50, %c0_51] : memref<128x256xf32, #tpu.memory_space<vmem>>, vector<128x256xf32>
    %cst_52 = arith.constant dense<0.000000e+00> : vector<4x256xf32>
    %135 = tpu.matmul %133, %134, %cst_52 {dimension_numbers = #tpu.dot_dimension_numbers<[1], [0], [0], [1], [0, 0, 1, 1], [], []>} : vector<4x128xf32>, vector<128x256xf32>, vector<4x256xf32> -> vector<4x256xf32>
    %136 = vector.extract_strided_slice %135 {offsets = [0, 0], sizes = [4, 128], strides = [1, 1]} : vector<4x256xf32> to vector<4x128xf32>
    %137 = vector.extract_strided_slice %135 {offsets = [0, 128], sizes = [4, 128], strides = [1, 1]} : vector<4x256xf32> to vector<4x128xf32>
    %138 = arith.select %2, %136, %137 : vector<4x128xi1>, vector<4x128xf32>
    %c24 = arith.constant 24 : index
    %c0_53 = arith.constant 0 : index
    %139 = vector.load %arg1[%c24, %c0_53] : memref<88x128xf32, #tpu.memory_space<vmem>>, vector<4x128xf32>
    %140 = arith.addf %138, %139 : vector<4x128xf32>
    %141 = math.tanh %140 : vector<4x128xf32>
    %cst_54 = arith.constant 1.200000e+00 : f32
    %cst_55 = arith.constant -8.000000e-01 : f32
    %142 = vector.broadcast %cst_54 : f32 to vector<4x128xf32>
    %143 = vector.broadcast %cst_55 : f32 to vector<4x128xf32>
    %144 = arith.select %2, %142, %143 : vector<4x128xi1>, vector<4x128xf32>
    %145 = arith.mulf %141, %144 : vector<4x128xf32>
    %c40 = arith.constant 40 : index
    %c0_56 = arith.constant 0 : index
    %146 = vector.load %arg1[%c40, %c0_56] : memref<88x128xf32, #tpu.memory_space<vmem>>, vector<4x128xf32>
    %147 = arith.mulf %78, %146 : vector<4x128xf32>
    %cst_57 = arith.constant dense<0.000000e+00> : vector<4xf32>
    %148 = vector.multi_reduction <add>, %147, %cst_57 [1] : vector<4x128xf32> to vector<4xf32>
    %149 = vector.shape_cast %148 : vector<4xf32> to vector<4x1xf32>
    %c48 = arith.constant 48 : index
    %c0_58 = arith.constant 0 : index
    %150 = vector.load %arg1[%c48, %c0_58] : memref<88x128xf32, #tpu.memory_space<vmem>>, vector<4x128xf32>
    %151 = arith.mulf %78, %150 : vector<4x128xf32>
    %cst_59 = arith.constant dense<0.000000e+00> : vector<4xf32>
    %152 = vector.multi_reduction <add>, %151, %cst_59 [1] : vector<4x128xf32> to vector<4xf32>
    %153 = vector.shape_cast %152 : vector<4xf32> to vector<4x1xf32>
    %154 = tpu.concatenate %149, %153 in 1 : vector<4x1xf32>, vector<4x1xf32> -> vector<4x2xf32>
    %cst_60 = arith.constant dense<0xFF800000> : vector<4xf32>
    %155 = vector.multi_reduction <maximumf>, %154, %cst_60 [1] : vector<4x2xf32> to vector<4xf32>
    %156 = vector.shape_cast %155 : vector<4xf32> to vector<4x1xf32>
    %157 = vector.broadcast %156 : vector<4x1xf32> to vector<4x2xf32>
    %158 = arith.subf %154, %157 : vector<4x2xf32>
    %159 = math.exp %158 : vector<4x2xf32>
    %cst_61 = arith.constant dense<0.000000e+00> : vector<4xf32>
    %160 = vector.multi_reduction <add>, %159, %cst_61 [1] : vector<4x2xf32> to vector<4xf32>
    %161 = vector.shape_cast %160 : vector<4xf32> to vector<4x1xf32>
    %162 = vector.broadcast %161 : vector<4x1xf32> to vector<4x2xf32>
    %163 = arith.divf %159, %162 : vector<4x2xf32>
    %c56 = arith.constant 56 : index
    %c0_62 = arith.constant 0 : index
    %164 = vector.load %arg1[%c56, %c0_62] : memref<88x128xf32, #tpu.memory_space<vmem>>, vector<4x128xf32>
    %165 = arith.mulf %78, %164 : vector<4x128xf32>
    %cst_63 = arith.constant dense<0.000000e+00> : vector<4xf32>
    %166 = vector.multi_reduction <add>, %165, %cst_63 [1] : vector<4x128xf32> to vector<4xf32>
    %167 = vector.shape_cast %166 : vector<4xf32> to vector<4x1xf32>
    %c64 = arith.constant 64 : index
    %c0_64 = arith.constant 0 : index
    %168 = vector.load %arg1[%c64, %c0_64] : memref<88x128xf32, #tpu.memory_space<vmem>>, vector<4x128xf32>
    %169 = arith.mulf %78, %168 : vector<4x128xf32>
    %cst_65 = arith.constant dense<0.000000e+00> : vector<4xf32>
    %170 = vector.multi_reduction <add>, %169, %cst_65 [1] : vector<4x128xf32> to vector<4xf32>
    %171 = vector.shape_cast %170 : vector<4xf32> to vector<4x1xf32>
    %172 = tpu.concatenate %167, %171 in 1 : vector<4x1xf32>, vector<4x1xf32> -> vector<4x2xf32>
    %173 = arith.negf %172 : vector<4x2xf32>
    %174 = math.exp %173 : vector<4x2xf32>
    %cst_66 = arith.constant 1.000000e+00 : f32
    %175 = vector.broadcast %cst_66 : f32 to vector<4x2xf32>
    %176 = arith.addf %175, %174 : vector<4x2xf32>
    %177 = arith.divf %175, %176 : vector<4x2xf32>
    %c32 = arith.constant 32 : index
    %c0_67 = arith.constant 0 : index
    %178 = vector.load %arg1[%c32, %c0_67] : memref<88x128xf32, #tpu.memory_space<vmem>>, vector<4x128xf32>
    %179 = vector.extract_strided_slice %178 {offsets = [0, 0], sizes = [4, 2], strides = [1, 1]} : vector<4x128xf32> to vector<4x2xf32>
    %180 = arith.mulf %179, %177 : vector<4x2xf32>
    %181 = arith.mulf %180, %163 : vector<4x2xf32>
    %cst_68 = arith.constant dense<0xFF800000> : vector<4xf32>
    %182 = vector.multi_reduction <maximumf>, %181, %cst_68 [1] : vector<4x2xf32> to vector<4xf32>
    %183 = vector.shape_cast %182 : vector<4xf32> to vector<4x1xf32>
    %184 = vector.broadcast %183 : vector<4x1xf32> to vector<4x2xf32>
    %185 = arith.subf %181, %184 : vector<4x2xf32>
    %186 = math.exp %185 : vector<4x2xf32>
    %cst_69 = arith.constant dense<0.000000e+00> : vector<4xf32>
    %187 = vector.multi_reduction <add>, %186, %cst_69 [1] : vector<4x2xf32> to vector<4xf32>
    %188 = vector.shape_cast %187 : vector<4xf32> to vector<4x1xf32>
    %189 = vector.broadcast %188 : vector<4x1xf32> to vector<4x2xf32>
    %190 = arith.divf %186, %189 : vector<4x2xf32>
    %191 = vector.extract_strided_slice %190 {offsets = [0, 0], sizes = [4, 1], strides = [1, 1]} : vector<4x2xf32> to vector<4x1xf32>
    %c72 = arith.constant 72 : index
    %c0_70 = arith.constant 0 : index
    %192 = vector.load %arg1[%c72, %c0_70] : memref<88x128xf32, #tpu.memory_space<vmem>>, vector<4x128xf32>
    %193 = vector.extract_strided_slice %192 {offsets = [0, 0], sizes = [4, 2], strides = [1, 1]} : vector<4x128xf32> to vector<4x2xf32>
    %194 = vector.broadcast %191 : vector<4x1xf32> to vector<4x2xf32>
    %195 = arith.mulf %194, %193 : vector<4x2xf32>
    %196 = vector.extract_strided_slice %190 {offsets = [0, 1], sizes = [4, 1], strides = [1, 1]} : vector<4x2xf32> to vector<4x1xf32>
    %c80 = arith.constant 80 : index
    %c0_71 = arith.constant 0 : index
    %197 = vector.load %arg1[%c80, %c0_71] : memref<88x128xf32, #tpu.memory_space<vmem>>, vector<4x128xf32>
    %198 = vector.extract_strided_slice %197 {offsets = [0, 0], sizes = [4, 2], strides = [1, 1]} : vector<4x128xf32> to vector<4x2xf32>
    %199 = vector.broadcast %196 : vector<4x1xf32> to vector<4x2xf32>
    %200 = arith.mulf %199, %198 : vector<4x2xf32>
    %201 = arith.addf %195, %200 : vector<4x2xf32>
    %cst_72 = arith.constant dense<0xFF800000> : vector<4xf32>
    %202 = vector.multi_reduction <maximumf>, %201, %cst_72 [1] : vector<4x2xf32> to vector<4xf32>
    %203 = vector.shape_cast %202 : vector<4xf32> to vector<4x1xf32>
    %204 = vector.broadcast %203 : vector<4x1xf32> to vector<4x2xf32>
    %205 = arith.subf %201, %204 : vector<4x2xf32>
    %206 = math.exp %205 : vector<4x2xf32>
    %cst_73 = arith.constant dense<0.000000e+00> : vector<4xf32>
    %207 = vector.multi_reduction <add>, %206, %cst_73 [1] : vector<4x2xf32> to vector<4xf32>
    %208 = vector.shape_cast %207 : vector<4xf32> to vector<4x1xf32>
    %209 = vector.broadcast %208 : vector<4x1xf32> to vector<4x2xf32>
    %210 = arith.divf %206, %209 : vector<4x2xf32>
    %211 = vector.extract_strided_slice %210 {offsets = [0, 0], sizes = [2, 1], strides = [1, 1]} : vector<4x2xf32> to vector<2x1xf32>
    %212 = vector.extract_strided_slice %145 {offsets = [0, 0], sizes = [1, 128], strides = [1, 1]} : vector<4x128xf32> to vector<1x128xf32>
    %213 = vector.broadcast %211 : vector<2x1xf32> to vector<2x128xf32>
    %214 = vector.broadcast %212 : vector<1x128xf32> to vector<2x128xf32>
    %215 = arith.mulf %213, %214 : vector<2x128xf32>
    %216 = vector.extract_strided_slice %210 {offsets = [2, 0], sizes = [2, 1], strides = [1, 1]} : vector<4x2xf32> to vector<2x1xf32>
    %217 = vector.extract_strided_slice %145 {offsets = [1, 0], sizes = [1, 128], strides = [1, 1]} : vector<4x128xf32> to vector<1x128xf32>
    %218 = vector.broadcast %216 : vector<2x1xf32> to vector<2x128xf32>
    %219 = vector.broadcast %217 : vector<1x128xf32> to vector<2x128xf32>
    %220 = arith.mulf %218, %219 : vector<2x128xf32>
    %221 = arith.addf %215, %220 : vector<2x128xf32>
    %222 = vector.extract_strided_slice %221 {offsets = [0, 0], sizes = [2, 8], strides = [1, 1]} : vector<2x128xf32> to vector<2x8xf32>
    %223 = vector.extract_strided_slice %210 {offsets = [0, 1], sizes = [2, 1], strides = [1, 1]} : vector<4x2xf32> to vector<2x1xf32>
    %224 = vector.extract_strided_slice %145 {offsets = [2, 0], sizes = [1, 128], strides = [1, 1]} : vector<4x128xf32> to vector<1x128xf32>
    %225 = vector.broadcast %223 : vector<2x1xf32> to vector<2x128xf32>
    %226 = vector.broadcast %224 : vector<1x128xf32> to vector<2x128xf32>
    %227 = arith.mulf %225, %226 : vector<2x128xf32>
    %228 = vector.extract_strided_slice %210 {offsets = [2, 1], sizes = [2, 1], strides = [1, 1]} : vector<4x2xf32> to vector<2x1xf32>
    %229 = vector.extract_strided_slice %145 {offsets = [3, 0], sizes = [1, 128], strides = [1, 1]} : vector<4x128xf32> to vector<1x128xf32>
    %230 = vector.broadcast %228 : vector<2x1xf32> to vector<2x128xf32>
    %231 = vector.broadcast %229 : vector<1x128xf32> to vector<2x128xf32>
    %232 = arith.mulf %230, %231 : vector<2x128xf32>
    %233 = arith.addf %227, %232 : vector<2x128xf32>
    %234 = vector.extract_strided_slice %233 {offsets = [0, 0], sizes = [2, 8], strides = [1, 1]} : vector<2x128xf32> to vector<2x8xf32>
    %235 = vector.extract_strided_slice %210 {offsets = [0, 0], sizes = [2, 2], strides = [1, 1]} : vector<4x2xf32> to vector<2x2xf32>
    %236 = vector.extract_strided_slice %210 {offsets = [2, 0], sizes = [2, 2], strides = [1, 1]} : vector<4x2xf32> to vector<2x2xf32>
    %237 = tpu.concatenate %222, %234, %235, %236 in 1 : vector<2x8xf32>, vector<2x8xf32>, vector<2x2xf32>, vector<2x2xf32> -> vector<2x20xf32>
    %c0_74 = arith.constant 0 : index
    %c0_75 = arith.constant 0 : index
    %238 = vector.load %arg5[%c0_74, %c0_75] : memref<2x20xf32, #tpu.memory_space<vmem>>, vector<2x20xf32>
    tpu.vector_store %arg5[%c0_74, %c0_75], %237 {strides = array<i32>} : memref<2x20xf32, #tpu.memory_space<vmem>>, vector<2x20xf32>,
    return
  }
}

</mosaic_0001>

<bundles_post_ra>
// kernel: strategy_superposition.1
= control target key start
LH: loop header
LB: loop body
LE: loop exit
PB: predicated region body
PF: predicated region fallthrough
CT: control target
= control target key end

     0   :  { %10 = vsyncpa [#allocation3], 0  ;;  %s968_s0 = inlined_call_operand.vmem [shape: f32[4,40], index: 0, kind: input, shape index: {}]   ;;  %s969_s1 = inlined_call_operand.hbm [shape: f32[88,128], index: 1, kind: input, shape index: {}]   ;;  %s970_s2 = inlined_call_operand.hbm [shape: f32[40,384], index: 2, kind: input, shape index: {}]   ;;  %s971_s3 = inlined_call_operand.hbm [shape: f32[128,256], index: 3, kind: input, shape index: {}]   ;;  %s972_s4 = inlined_call_operand.hbm [shape: f32[128,256], index: 4, kind: input, shape index: {}]   ;;  %s973_s5 = inlined_call_operand.vmem [shape: f32[2,20], index: 5, kind: output, shape index: {}]  }
   0x1   :  { %11 = vsyncpa [#allocation5], 0  ;;  %s32_s20 = sshll.u32 %s970_s2, 4  ;;  %s33_s20 = int_to_ptr.hbm [resolvable:$true] %s32_s20 }
   0x2   :  { %12 = vsyncpa [#allocation8], 0  ;;  %s825_s21 = smov [#allocation4]   ;;  %s19_s25 = sshll.u32 %s969_s1, 4  ;;  %s20_s25 = int_to_ptr.hbm [resolvable:$true] %s19_s25 }
   0x3   :  { %s34_s22 = sshll.u32 %s825_s21, 4  ;;  %s826_s26 = smov 384   ;;  %s35_s22 = int_to_ptr.vmem [resolvable:$true] %s34_s22 }
   0x4   :  { %s827_s27 = smov 24   ;;  %s828_s28 = smov [#allocation2]  }
   0x5   :  { %40 = dma.hbm_to_vmem [thread:$0]  %s33_s20, 1920, %s35_s22, [#allocation5], %s826_s26, %s826_s26, %s827_s27  }
   0x6   :  { %s21_s29 = sshll.u32 %s828_s28, 4  ;;  %s829_s30 = smov 128   ;;  %s22_s29 = int_to_ptr.vmem [resolvable:$true] %s21_s29 }
   0x7   :  { %s830_s6 = smov 8   ;;  %s45_s8 = sshll.u32 %s971_s3, 4  ;;  %s46_s8 = int_to_ptr.hbm [resolvable:$true] %s45_s8 }
   0x8   :  { %27 = dma.hbm_to_vmem [thread:$0]  %s20_s25, 1408, %s22_s29, [#allocation3], %s829_s30, %s829_s30, %s830_s6  }
   0x9   :  { %s831_s9 = smov [#allocation6]   ;;  %s58_s12 = sshll.u32 %s972_s4, 4  ;;  %s59_s12 = int_to_ptr.hbm [resolvable:$true] %s58_s12 }
   0xa   :  { %s47_s10 = sshll.u32 %s831_s9, 4  ;;  %s832_s13 = smov 256   ;;  %s48_s10 = int_to_ptr.vmem [resolvable:$true] %s47_s10 }
   0xb   :  { %s833_s14 = smov 16   ;;  %s834_s15 = smov [#allocation7]  }
   0xc   :  { %53 = dma.hbm_to_vmem [thread:$0]  %s46_s8, 4096, %s48_s10, [#allocation5], %s832_s13, %s832_s13, %s833_s14  }
   0xd   :  { %s60_s16 = sshll.u32 %s834_s15, 4  ;;  %s61_s16 = int_to_ptr.vmem [resolvable:$true] %s60_s16 }
   0xe   :  { %66 = dma.hbm_to_vmem [thread:$0]  %s59_s12, 4096, %s61_s16, [#allocation8], %s832_s13, %s832_s13, %s833_s14  }
   0xf   :  { %819 = dma.done.wait [#allocation3], 1408  }
  0x10   :  { %820 = vsyncadd [#allocation3], 4294965888 }
  0x11   :  { %821 = dma.done.wait [#allocation5], 6016  }
  0x12   :  { %822 = vsyncadd [#allocation5], 4294961280 }
  0x13   :  { %823 = dma.done.wait [#allocation8], 4096  }
  0x14   :  { %824 = vsyncadd [#allocation8], 4294963200  ;;  %v99_v0 = vld [vmem:[#allocation4 + $0x60] sm:$0xff]  ;;  %v101_v1 = vld [vmem:[#allocation4 + $0x70] sm:$0xff]  ;;  %vm102_vm0 = vcmask 326656   ;;  %vm229_vm1 = vcmask 1043456  }
  0x15   :  { %v96_v2 = vld [vmem:[#allocation4 + $0x48] sm:$0xff]  ;;  %117 = vmatpush.msra.mxu0 %v99_v0  ;;  %157 = vmatpush.msra.mxu2 %v101_v1  ;;  %v98_v3 = vld [vmem:[#allocation4 + $0x58] sm:$0xff]  ;;  %v93_v4 = vld [vmem:[#allocation4 + $0x30] sm:$0xff]  ;;  %vm486_vm12 = vcmask 7168   ;;  %vm488_vm13 = vcmask 11264  }
  0x16   :  { %v95_v5 = vld [vmem:[#allocation4 + $0x40] sm:$0xff]  ;;  %v100_v6 = vld [vmem:[#allocation4 + $0x68] sm:$0xff]  ;;  %v90_v7 = vld [vmem:[#allocation4 + $0x18] sm:$0xff] }
  0x17   :  { %118 = vmatpush.msra.mxu0 %v96_v2  ;;  %158 = vmatpush.msra.mxu2 %v98_v3  ;;  %v92_v8 = vld [vmem:[#allocation4 + $0x28] sm:$0xff]  ;;  %v97_v9 = vld [vmem:[#allocation4 + $0x50] sm:$0xff]  ;;  %v94_v10 = vld [vmem:[#allocation4 + $0x38] sm:$0xff]  ;;  %v83_v3 = vlaneseq }
  0x18   :  { %137 = vmatpush.msra.mxu1 %v100_v6  ;;  %v87_v11 = vld [vmem:[#allocation4] sm:$0xff]  ;;  %v89_v12 = vld [vmem:[#allocation4 + $0x10] sm:$0xff]  ;;  %v86_v13 = vld [vmem:[%s968_s0] sm:$0xf]  ;;  %v835_v6 = vmov -1.0   ;;  %s840_s0 = smov 18  }
  0x19   :  { %119 = vmatpush.msra.mxu0 %v93_v4  ;;  %159 = vmatpush.msra.mxu2 %v95_v5  ;;  %v91_v14 = vld [vmem:[#allocation4 + $0x20] sm:$0xff]  ;;  %v88_v15 = vld [vmem:[#allocation4 + $0x8] sm:$0xff]  ;;  %v476_v25 = vld [vmem:[#allocation2 + $0x28] sm:$0xf] }
  0x1a   :  { %138 = vmatpush.msra.mxu1 %v97_v9  ;;  %v481_v29 = vld [vmem:[#allocation2 + $0x30] sm:$0xf]  ;;  %v518_v40 = vld [vmem:[#allocation2 + $0x40] sm:$0xf] }
  0x1b   :  { %120 = vmatpush.msra.mxu0 %v90_v7  ;;  %160 = vmatpush.msra.mxu2 %v92_v8 }
  0x1c   :  { %139 = vmatpush.msra.mxu1 %v94_v10  ;;  %v908_v10 = vshrl.u32 %v83_v3, 7  ;;  %v269_v3 = vld [vmem:[#allocation6 + $0x38] sm:$0xff] }
  0x1d   :  { %121 = vmatpush.msra.mxu0 %v87_v11  ;;  %161 = vmatpush.msra.mxu2 %v89_v12 }
  0x1e   :  { %659 = vmatmul.msk.f32.vlgmr.msra.gmra.mxu0 %vm102_vm0, %v86_v13  ;;  %661 = vmatmul.msk.f32.vlgmr.msra.gmra.mxu2 %vm102_vm0, %v86_v13  ;;  %vm85_vm11 = vcmp.lt.s32.totalorder %v908_v10, 2 }
  0x1f   :  { %140 = vmatpush.msra.mxu1 %v91_v14 }
  0x21   :  { %141 = vmatpush.msra.mxu1 %v88_v15 }
  0x22   :  { %660 = vmatmul.msk.f32.vlgmr.msra.gmra.mxu1 %vm102_vm0, %v86_v13 }
  0x9b   :  { %v889_v16 = vpop.f32.mrf.mxu0 }
  0x9c   :  { %v892_v17 = vmul.f32 0.70710677, %v889_v16  ;;  %v166_v11 = vmul.f32 0.5, %v889_v16 }
  0x9e   :  { %v170_v18 = vand.u32 2147483647, %v892_v17  ;;  %vm168_vm9 = vcmp.ge.f32.partialorder %v892_v17, 0.0 }
  0x9f   :  { %v895_v19 = vpop.f32.mrf.mxu1  ;;  %v169_v7 = vsel %vm168_vm9, 1.0, %v835_v6 }
  0xa0   :  { %v171_v20 = vmul.f32 0.3275911, %v170_v18  ;;  %v662_v21 = vmul.f32 -1.442695, %v895_v19  ;;  %v197_v42 = vsub.f32 0.0, %v170_v18 }
  0xa1   :  { %v163_v22 = vpop.f32.mrf.mxu2 }
  0xa2   :  { %v172_v23 = vadd.f32 1.0, %v171_v20  ;;  %v898_v24 = vmax.f32 %v163_v22, 0.0  ;;  %685 = vpow2.f32 %v662_v21  ;;  %v198_v48 = vmul.f32 %v197_v42, %v170_v18 }
  0xa4   :  { %687 = vrcp.f32 %v172_v23  ;;  %v477_v26 = vmul.f32 %v476_v25, %v898_v24  ;;  %v482_v33 = vmul.f32 %v481_v29, %v898_v24  ;;  %v184_v34 = vand.u32 2147483648, %v172_v23 }
  0xa5   :  { %vm178_vm2 = vweird.f32 %v172_v23  ;;  %v182_v36 = vand.u32 2147483647, %v172_v23  ;;  %v519_v44 = vmul.f32 %v518_v40, %v898_v24  ;;  %v199_v53 = vmul.f32 1.442695, %v198_v48  ;;  %v290_v40 = vld [vmem:[#allocation6 + $0xe0] sm:$0xff] }
  0xa6   :  { %v478_v27 = vsel %vm229_vm1, %v477_v26, 0.0  ;;  %v483_v38 = vsel %vm229_vm1, %v482_v33, 0.0  ;;  %v185_v39 = vor.u32 1.1754944e-38, %v184_v34  ;;  %v286_v48 = vld [vmem:[#allocation6 + $0xc0] sm:$0xff] }
  0xa7   :  { %479 = vadd.xlane.f32.xlu0 %v478_v27  ;;  %vm183_vm5 = vcmp.eq.f32.partialorder %v182_v36, 8.507059e+37  ;;  %v520_v51 = vsel %vm229_vm1, %v519_v44, 0.0 }
  0xa8   :  { %v686_v28 = vpop.eup %685 }
  0xa9   :  { %v209_v31 = vadd.f32 1.0, %v686_v28 }
  0xaa   :  { %v688_v30 = vpop.eup %687 }
  0xab   :  { %v174_v32 = vmul.f32 %v688_v30, %v172_v23  ;;  %vm179_vm3 = vweird.f32 %v688_v30  ;;  %689 = vrcp.f32 %v209_v31  ;;  %vm215_vm6 = vweird.f32 %v209_v31 }
  0xac   :  { %vm180_vm4 = vmor %vm178_vm2, %vm179_vm3  ;;  %691 = vpow2.f32 %v199_v53  ;;  %v221_v60 = vand.u32 2147483648, %v209_v31  ;;  %v219_v63 = vand.u32 2147483647, %v209_v31  ;;  %v836_v23 = vmov 128.0   ;;  %v283_v53 = vld [vmem:[#allocation6 + $0xa8] sm:$0xff] }
  0xad   :  { %v175_v35 = vsub.f32 1.0, %v174_v32  ;;  %693 = vrcp.f32 %v836_v23 }
  0xae   :  { %v222_v2 = vor.u32 1.1754944e-38, %v221_v60  ;;  %vm220_vm10 = vcmp.eq.f32.partialorder %v219_v63, 8.507059e+37  ;;  %v274_v60 = vld [vmem:[#allocation6 + $0x60] sm:$0xff]  ;;  %v273_v63 = vld [vmem:[#allocation6 + $0x58] sm:$0xff] }
  0xaf   :  { %v176_v37 = vmul.f32 %v688_v30, %v175_v35  ;;  %484 = vadd.xlane.f32.xlu0 %v483_v38  ;;  %v513_v35 = vld [vmem:[#allocation2 + $0x38] sm:$0xf]  ;;  %v292_v38 = vld [vmem:[#allocation6 + $0xf0] sm:$0xff] }
  0xb0   :  { %v514_v36 = vmul.f32 %v513_v35, %v898_v24  ;;  %294 = vmatpush.msra.mxu3 %v292_v38 }
  0xb1   :  { %v177_v41 = vadd.f32 %v688_v30, %v176_v37  ;;  %v690_v45 = vpop.eup %689 }
  0xb2   :  { %v211_v50 = vmul.f32 %v690_v45, %v209_v31  ;;  %vm216_vm7 = vweird.f32 %v690_v45  ;;  %v692_v0 = vpop.eup %691  ;;  %v515_v37 = vsel %vm229_vm1, %v514_v36, 0.0  ;;  %295 = vmatpush.msra.mxu3 %v290_v40 }
  0xb3   :  { %v181_v43 = vsel %vm180_vm4, %v688_v30, %v177_v41  ;;  %vm217_vm8 = vmor %vm215_vm6, %vm216_vm7  ;;  %v291_v41 = vld [vmem:[#allocation6 + $0xe8] sm:$0xff] }
  0xb4   :  { %v186_v46 = vsel %vm183_vm5, %v185_v39, %v181_v43  ;;  %v212_v55 = vsub.f32 1.0, %v211_v50  ;;  %v293_v39 = vld [vmem:[#allocation6 + $0xf8] sm:$0xff]  ;;  %v284_v50 = vld [vmem:[#allocation6 + $0xb0] sm:$0xff] }
  0xb5   :  { %v188_v47 = vmul.f32 1.0614054, %v186_v46  ;;  %314 = vmatpush.msrb.mxu0 %v293_v39 }
  0xb6   :  { %v213_v58 = vmul.f32 %v690_v45, %v212_v55  ;;  %v281_v55 = vld [vmem:[#allocation6 + $0x98] sm:$0xff] }
  0xb7   :  { %v189_v49 = vadd.f32 -1.4531521, %v188_v47  ;;  %521 = vadd.xlane.f32.xlu0 %v520_v51  ;;  %315 = vmatpush.msrb.mxu0 %v291_v41  ;;  %v289_v47 = vld [vmem:[#allocation6 + $0xd8] sm:$0xff] }
  0xb8   :  { %v214_v62 = vadd.f32 %v690_v45, %v213_v58  ;;  %v285_v51 = vld [vmem:[#allocation6 + $0xb8] sm:$0xff]  ;;  %v276_v58 = vld [vmem:[#allocation6 + $0x70] sm:$0xff] }
  0xb9   :  { %v190_v52 = vmul.f32 %v189_v49, %v186_v46  ;;  %316 = vmatpush.msrb.mxu0 %v289_v47  ;;  %v287_v49 = vld [vmem:[#allocation6 + $0xc8] sm:$0xff] }
  0xba   :  { %v218_v5 = vsel %vm217_vm8, %v690_v45, %v214_v62  ;;  %v272_v62 = vld [vmem:[#allocation6 + $0x50] sm:$0xff] }
  0xbb   :  { %v191_v54 = vadd.f32 1.4214138, %v190_v52  ;;  %v223_v9 = vsel %vm220_vm10, %v222_v2, %v218_v5  ;;  %317 = vmatpush.msrb.mxu0 %v287_v49  ;;  %v282_v52 = vld [vmem:[#allocation6 + $0xa0] sm:$0xff]  ;;  %v268_v2 = vld [vmem:[#allocation6 + $0x30] sm:$0xff]  ;;  %v267_v5 = vld [vmem:[#allocation6 + $0x28] sm:$0xff] }
  0xbc   :  { %v225_v14 = vmul.f32 %v223_v9, %v895_v19  ;;  %v694_v19 = vpop.eup %693  ;;  %v262_v9 = vld [vmem:[#allocation6] sm:$0xff] }
  0xbd   :  { %v192_v56 = vmul.f32 %v191_v54, %v186_v46  ;;  %v234_v25 = vmul.f32 128.0, %v694_v19  ;;  %vm238_vm14 = vweird.f32 %v694_v19  ;;  %318 = vmatpush.msrb.mxu0 %v285_v51  ;;  %v280_v54 = vld [vmem:[#allocation6 + $0x90] sm:$0xff] }
  0xbf   :  { %v193_v57 = vadd.f32 -0.28449672, %v192_v56  ;;  %v235_v26 = vsub.f32 1.0, %v234_v25  ;;  %319 = vmatpush.msrb.mxu0 %v283_v53  ;;  %v278_v56 = vld [vmem:[#allocation6 + $0x80] sm:$0xff]  ;;  %v228_v25 = vld [vmem:[#allocation2 + $0x8] sm:$0xf] }
  0xc0   :  { %v543_v53 = vld [vmem:[#allocation2 + $0x20] sm:$0xf] }
  0xc1   :  { %v194_v59 = vmul.f32 %v193_v57, %v186_v46  ;;  %v236_v27 = vmul.f32 %v694_v19, %v235_v26  ;;  %320 = vmatpush.msrb.mxu0 %v281_v55  ;;  %v279_v57 = vld [vmem:[#allocation6 + $0x88] sm:$0xff] }
  0xc3   :  { %v195_v61 = vadd.f32 0.2548296, %v194_v59  ;;  %v237_v28 = vadd.f32 %v694_v19, %v236_v27  ;;  %321 = vmatpush.msrb.mxu0 %v279_v57  ;;  %v277_v59 = vld [vmem:[#allocation6 + $0x78] sm:$0xff] }
  0xc5   :  { %v196_v1 = vmul.f32 %v195_v61, %v186_v46  ;;  %v918_v29 = vsel %vm238_vm14, %v694_v19, %v237_v28  ;;  %v288_v46 = vld [vmem:[#allocation6 + $0xd0] sm:$0xff]  ;;  %322 = vmatpush.msrb.mxu0 %v277_v59  ;;  %v275_v61 = vld [vmem:[#allocation6 + $0x68] sm:$0xff] }
  0xc6   :  { %296 = vmatpush.msra.mxu3 %v288_v46 }
  0xc7   :  { %v201_v4 = vmul.f32 %v692_v0, %v196_v1  ;;  %323 = vmatpush.msrb.mxu0 %v275_v61  ;;  %v270_v0 = vld [vmem:[#allocation6 + $0x40] sm:$0xff]  ;;  %v271_v1 = vld [vmem:[#allocation6 + $0x48] sm:$0xff]  ;;  %v429_v61 = vld [vmem:[#allocation7 + $0xf8] sm:$0xff] }
  0xc8   :  { %297 = vmatpush.msra.mxu3 %v286_v48  ;;  %450 = vmatpush.msrb.mxu2 %v429_v61 }
  0xc9   :  { %v202_v8 = vsub.f32 1.0, %v201_v4  ;;  %324 = vmatpush.msrb.mxu0 %v273_v63  ;;  %v266_v4 = vld [vmem:[#allocation6 + $0x20] sm:$0xff]  ;;  %v427_v63 = vld [vmem:[#allocation7 + $0xe8] sm:$0xff] }
  0xca   :  { %298 = vmatpush.msra.mxu3 %v284_v50  ;;  %451 = vmatpush.msrb.mxu2 %v427_v63 }
  0xcb   :  { %v203_v12 = vmul.f32 %v202_v8, %v169_v7  ;;  %325 = vmatpush.msrb.mxu0 %v271_v1  ;;  %v264_v7 = vld [vmem:[#allocation6 + $0x10] sm:$0xff]  ;;  %v265_v8 = vld [vmem:[#allocation6 + $0x18] sm:$0xff] }
  0xcc   :  { %299 = vmatpush.msra.mxu3 %v282_v52  ;;  %v425_v1 = vld [vmem:[#allocation7 + $0xd8] sm:$0xff] }
  0xcd   :  { %v204_v13 = vadd.f32 1.0, %v203_v12  ;;  %326 = vmatpush.msrb.mxu0 %v269_v3  ;;  %v423_v3 = vld [vmem:[#allocation7 + $0xc8] sm:$0xff]  ;;  %452 = vmatpush.msrb.mxu2 %v425_v1 }
  0xce   :  { %300 = vmatpush.msra.mxu3 %v280_v54 }
  0xcf   :  { %v205_v15 = vmul.f32 %v204_v13, %v166_v11  ;;  %327 = vmatpush.msrb.mxu0 %v267_v5  ;;  %v263_v11 = vld [vmem:[#allocation6 + $0x8] sm:$0xff]  ;;  %453 = vmatpush.msrb.mxu2 %v423_v3  ;;  %v418_v5 = vld [vmem:[#allocation7 + $0xa0] sm:$0xff] }
  0xd0   :  { %301 = vmatpush.msra.mxu3 %v278_v56 }
  0xd1   :  { %v226_v17 = vsel %vm85_vm11, %v205_v15, %v225_v14  ;;  %328 = vmatpush.msrb.mxu0 %v265_v8  ;;  %v416_v8 = vld [vmem:[#allocation7 + $0x90] sm:$0xff] }
  0xd2   :  { %v230_v18 = vsel %vm229_vm1, %v226_v17, 0.0  ;;  %302 = vmatpush.msra.mxu3 %v276_v58 }
  0xd3   :  { %231 = vadd.xlane.f32.xlu1 %v230_v18  ;;  %329 = vmatpush.msrb.mxu0 %v263_v11  ;;  %v335_v11 = vld [vmem:[#allocation2 + $0x10] sm:$0xf] }
  0xd4   :  { %303 = vmatpush.msra.mxu3 %v274_v60  ;;  %v428_v60 = vld [vmem:[#allocation7 + $0xf0] sm:$0xff] }
  0xd5   :  { %430 = vmatpush.msrb.mxu1 %v428_v60 }
  0xd6   :  { %304 = vmatpush.msra.mxu3 %v272_v62  ;;  %v426_v62 = vld [vmem:[#allocation7 + $0xe0] sm:$0xff] }
  0xd7   :  { %431 = vmatpush.msrb.mxu1 %v426_v62 }
  0xd8   :  { %305 = vmatpush.msra.mxu3 %v270_v0  ;;  %v424_v0 = vld [vmem:[#allocation7 + $0xd0] sm:$0xff] }
  0xd9   :  { %432 = vmatpush.msrb.mxu1 %v424_v0 }
  0xda   :  { %306 = vmatpush.msra.mxu3 %v268_v2  ;;  %v422_v2 = vld [vmem:[#allocation7 + $0xc0] sm:$0xff] }
  0xdb   :  { %433 = vmatpush.msrb.mxu1 %v422_v2 }
  0xdc   :  { %307 = vmatpush.msra.mxu3 %v266_v4  ;;  %v421_v4 = vld [vmem:[#allocation7 + $0xb8] sm:$0xff] }
  0xdd   :  { %454 = vmatpush.msrb.mxu2 %v421_v4 }
  0xde   :  { %308 = vmatpush.msra.mxu3 %v264_v7  ;;  %v419_v7 = vld [vmem:[#allocation7 + $0xa8] sm:$0xff] }
  0xdf   :  { %455 = vmatpush.msrb.mxu2 %v419_v7 }
  0xe0   :  { %309 = vmatpush.msra.mxu3 %v262_v9  ;;  %v417_v9 = vld [vmem:[#allocation7 + $0x98] sm:$0xff] }
  0xe1   :  { %456 = vmatpush.msrb.mxu2 %v417_v9 }
 0x11a   :  { %v480_v20 = vpop.xlane.xlu0 %479 }
 0x122   :  { %v485_v21 = vpop.xlane.xlu0 %484 }
 0x123   :  { %v487_v22 = vsel %vm486_vm12, %v480_v20, %v485_v21 }
 0x124   :  { %v489_v16 = vsel %vm488_vm13, %v487_v22, -inf }
 0x125   :  { %490 = vmax.xlane.f32.xlu1 %v489_v16  ;;  %v227_v16 = vld [vmem:[#allocation2] sm:$0xf] }
 0x146   :  { %v232_v30 = vpop.xlane.xlu1 %231 }
 0x147   :  { %v240_v31 = vmul.f32 %v918_v29, %v232_v30 }
 0x149   :  { %v921_v32 = vsub.f32 %v226_v17, %v240_v31 }
 0x14b   :  { %v242_v33 = vmul.f32 %v921_v32, %v921_v32 }
 0x14d   :  { %v243_v34 = vsel %vm229_vm1, %v242_v33, 0.0 }
 0x14e   :  { %244 = vadd.xlane.f32.xlu2 %v243_v34 }
 0x156   :  { %516 = vadd.xlane.f32.xlu2 %v515_v37 }
 0x198   :  { %v491_v42 = vpop.xlane.xlu1 %490 }
 0x199   :  { %v492_v43 = vsub.f32 %v487_v22, %v491_v42 }
 0x19b   :  { %v493_v44 = vmul.f32 1.442695, %v492_v43 }
 0x19d   :  { %695 = vpow2.f32 %v493_v44 }
 0x1a3   :  { %v928_v45 = vpop.eup %695 }
 0x1a4   :  { %v495_v24 = vsel %vm488_vm13, %v928_v45, 0.0 }
 0x1a5   :  { %496 = vadd.xlane.f32.xlu1 %v495_v24 }
 0x1c1   :  { %v245_v12 = vpop.xlane.xlu2 %244 }
 0x1c2   :  { %v246_v13 = vmul.f32 %v245_v12, %v918_v29  ;;  %v522_v29 = vpop.xlane.xlu0 %521  ;;  %v414_v12 = vld [vmem:[#allocation7 + $0x80] sm:$0xff] }
 0x1c4   :  { %v247_v14 = vadd.f32 1e-05, %v246_v13  ;;  %v415_v13 = vld [vmem:[#allocation7 + $0x88] sm:$0xff] }
 0x1c5   :  { %457 = vmatpush.msrb.mxu2 %v415_v13 }
 0x1c6   :  { %697 = vrsqrt.f32 %v247_v14  ;;  %vm254_vm0 = vweird.f32 %v247_v14 }
 0x1c9   :  { %v517_v28 = vpop.xlane.xlu2 %516 }
 0x1ca   :  { %v523_v30 = vsel %vm486_vm12, %v517_v28, %v522_v29  ;;  %v406_v28 = vld [vmem:[#allocation7 + $0x40] sm:$0xff]  ;;  %v407_v29 = vld [vmem:[#allocation7 + $0x48] sm:$0xff] }
 0x1cb   :  { %v664_v31 = vmul.f32 -1.442695, %v523_v30 }
 0x1cc   :  { %v698_v15 = vpop.eup %697 }
 0x1cd   :  { %v249_v17 = vmul.f32 %v698_v15, %v247_v14  ;;  %vm255_vm15 = vweird.f32 %v698_v15  ;;  %699 = vpow2.f32 %v664_v31  ;;  %v404_v31 = vld [vmem:[#allocation7 + $0x30] sm:$0xff] }
 0x1ce   :  { %vm256_vm1 = vmor %vm254_vm0, %vm255_vm15 }
 0x1cf   :  { %v250_v18 = vmul.f32 %v698_v15, %v249_v17 }
 0x1d1   :  { %v251_v20 = vmul.f32 0.5, %v250_v18  ;;  %v412_v18 = vld [vmem:[#allocation7 + $0x70] sm:$0xff] }
 0x1d3   :  { %v252_v21 = vsub.f32 1.5, %v251_v20  ;;  %v700_v33 = vpop.eup %699  ;;  %v413_v20 = vld [vmem:[#allocation7 + $0x78] sm:$0xff] }
 0x1d4   :  { %v527_v34 = vadd.f32 1.0, %v700_v33  ;;  %458 = vmatpush.msrb.mxu2 %v413_v20  ;;  %v405_v33 = vld [vmem:[#allocation7 + $0x38] sm:$0xff] }
 0x1d5   :  { %v253_v22 = vmul.f32 %v698_v15, %v252_v21 }
 0x1d6   :  { %701 = vrcp.f32 %v527_v34  ;;  %v539_v42 = vand.u32 2147483648, %v527_v34  ;;  %vm533_vm3 = vweird.f32 %v527_v34  ;;  %v537_v44 = vand.u32 2147483647, %v527_v34 }
 0x1d7   :  { %v257_v23 = vsel %vm256_vm1, %v698_v15, %v253_v22  ;;  %v410_v22 = vld [vmem:[#allocation7 + $0x60] sm:$0xff] }
 0x1d8   :  { %v258_v19 = vmul.f32 %v257_v23, %v921_v32  ;;  %v540_v49 = vor.u32 1.1754944e-38, %v539_v42  ;;  %vm538_vm7 = vcmp.eq.f32.partialorder %v537_v44, 8.507059e+37 }
 0x1da   :  { %v259_v26 = vmul.f32 %v258_v19, %v227_v16  ;;  %v411_v16 = vld [vmem:[#allocation7 + $0x68] sm:$0xff]  ;;  %v408_v19 = vld [vmem:[#allocation7 + $0x50] sm:$0xff] }
 0x1db   :  { %459 = vmatpush.msrb.mxu2 %v411_v16 }
 0x1dc   :  { %v260_v27 = vadd.f32 %v259_v26, %v228_v25  ;;  %v702_v35 = vpop.eup %701  ;;  %v409_v25 = vld [vmem:[#allocation7 + $0x58] sm:$0xff] }
 0x1dd   :  { %v529_v36 = vmul.f32 %v702_v35, %v527_v34  ;;  %vm534_vm2 = vweird.f32 %v702_v35  ;;  %460 = vmatpush.msrb.mxu2 %v409_v25 }
 0x1de   :  { %310 = vmatmul.f32.vlgmr.msra.gmra.mxu3 %v260_v27  ;;  %330 = vmatmul.f32.vlgmr.msrb.gmra.mxu0 %v260_v27  ;;  %vm535_vm4 = vmor %vm533_vm3, %vm534_vm2 }
 0x1df   :  { %v530_v38 = vsub.f32 1.0, %v529_v36  ;;  %461 = vmatpush.msrb.mxu2 %v407_v29  ;;  %v403_v36 = vld [vmem:[#allocation7 + $0x28] sm:$0xff]  ;;  %v838_v29 = vmov 0  }
 0x1e0   :  { %681 = vset.pattern.permute.xlu1 %v838_v29 }
 0x1e1   :  { %v531_v32 = vmul.f32 %v702_v35, %v530_v38  ;;  %462 = vmatpush.msrb.mxu2 %v405_v33  ;;  %v401_v38 = vld [vmem:[#allocation7 + $0x18] sm:$0xff] }
 0x1e3   :  { %v532_v41 = vadd.f32 %v702_v35, %v531_v32  ;;  %463 = vmatpush.msrb.mxu2 %v403_v36  ;;  %v398_v32 = vld [vmem:[#allocation7] sm:$0xff] }
 0x1e5   :  { %v536_v48 = vsel %vm535_vm4, %v702_v35, %v532_v41  ;;  %v402_v35 = vld [vmem:[#allocation7 + $0x20] sm:$0xff]  ;;  %464 = vmatpush.msrb.mxu2 %v401_v38 }
 0x1e6   :  { %v541_v52 = vsel %vm538_vm7, %v540_v49, %v536_v48 }
 0x1e7   :  { %v544_v57 = vmul.f32 %v543_v53, %v541_v52 }
 0x218   :  { %v497_v37 = vpop.xlane.xlu1 %496 }
 0x219   :  { %703 = vrcp.f32 %v497_v37  ;;  %v509_v46 = vand.u32 2147483648, %v497_v37  ;;  %v507_v24 = vand.u32 2147483647, %v497_v37  ;;  %vm503_vm6 = vweird.f32 %v497_v37 }
 0x21b   :  { %v510_v51 = vor.u32 1.1754944e-38, %v509_v46  ;;  %vm508_vm9 = vcmp.eq.f32.partialorder %v507_v24, 8.507059e+37 }
 0x21f   :  { %v704_v39 = vpop.eup %703 }
 0x220   :  { %v499_v40 = vmul.f32 %v704_v39, %v497_v37  ;;  %vm504_vm5 = vweird.f32 %v704_v39  ;;  %v400_v37 = vld [vmem:[#allocation7 + $0x10] sm:$0xff] }
 0x221   :  { %vm505_vm8 = vmor %vm503_vm6, %vm504_vm5 }
 0x222   :  { %v500_v43 = vsub.f32 1.0, %v499_v40 }
 0x224   :  { %v501_v47 = vmul.f32 %v704_v39, %v500_v43 }
 0x226   :  { %v502_v50 = vadd.f32 %v704_v39, %v501_v47 }
 0x228   :  { %v506_v54 = vsel %vm505_vm8, %v704_v39, %v502_v50  ;;  %v399_v39 = vld [vmem:[#allocation7 + $0x8] sm:$0xff] }
 0x229   :  { %v511_v55 = vsel %vm508_vm9, %v510_v51, %v506_v54  ;;  %465 = vmatpush.msrb.mxu2 %v399_v39 }
 0x22a   :  { %v512_v56 = vmul.f32 %v928_v45, %v511_v55  ;;  %v420_v45 = vld [vmem:[#allocation7 + $0xb0] sm:$0xff] }
 0x22b   :  { %434 = vmatpush.msrb.mxu1 %v420_v45 }
 0x22c   :  { %v936_v58 = vmul.f32 %v544_v57, %v512_v56 }
 0x22d   :  { %435 = vmatpush.msrb.mxu1 %v418_v5 }
 0x22e   :  { %v546_v59 = vsel %vm488_vm13, %v936_v58, -inf }
 0x22f   :  { %547 = vmax.xlane.f32.xlu2 %v546_v59  ;;  %436 = vmatpush.msrb.mxu1 %v416_v8 }
 0x231   :  { %437 = vmatpush.msrb.mxu1 %v414_v12 }
 0x233   :  { %438 = vmatpush.msrb.mxu1 %v412_v18 }
 0x235   :  { %439 = vmatpush.msrb.mxu1 %v410_v22 }
 0x237   :  { %440 = vmatpush.msrb.mxu1 %v408_v19 }
 0x239   :  { %441 = vmatpush.msrb.mxu1 %v406_v28  ;;  %v837_v28 = vmov 1  }
 0x23a   :  { %682 = vset.pattern.permute.xlu2 %v837_v28  ;;  %683 = vset.pattern.permute.xlu0 %v837_v28 }
 0x23b   :  { %442 = vmatpush.msrb.mxu1 %v404_v31 }
 0x23d   :  { %443 = vmatpush.msrb.mxu1 %v402_v35 }
 0x23f   :  { %444 = vmatpush.msrb.mxu1 %v400_v37 }
 0x241   :  { %445 = vmatpush.msrb.mxu1 %v398_v32 }
 0x25b   :  { %v331_v14 = vpop.f32.mrf.mxu0 }
 0x261   :  { %v311_v15 = vpop.f32.mrf.mxu3 }
 0x262   :  { %v334_v17 = vsel %vm85_vm11, %v311_v15, %v331_v14 }
 0x263   :  { %v942_v21 = vadd.f32 %v335_v11, %v334_v17 }
 0x265   :  { %v945_v23 = vmul.f32 0.70710677, %v942_v21  ;;  %v663_v27 = vmul.f32 -1.442695, %v942_v21  ;;  %v337_v18 = vmul.f32 0.5, %v942_v21 }
 0x267   :  { %v341_v26 = vand.u32 2147483647, %v945_v23  ;;  %705 = vpow2.f32 %v663_v27  ;;  %vm339_vm1 = vcmp.ge.f32.partialorder %v945_v23, 0.0 }
 0x268   :  { %v340_v13 = vsel %vm339_vm1, 1.0, %v835_v6 }
 0x269   :  { %v342_v30 = vmul.f32 0.3275911, %v341_v26  ;;  %v368_v51 = vsub.f32 0.0, %v341_v26 }
 0x26b   :  { %v343_v34 = vadd.f32 1.0, %v342_v30  ;;  %v369_v56 = vmul.f32 %v368_v51, %v341_v26 }
 0x26d   :  { %707 = vrcp.f32 %v343_v34  ;;  %v706_v40 = vpop.eup %705  ;;  %v355_v46 = vand.u32 2147483648, %v343_v34  ;;  %v353_v24 = vand.u32 2147483647, %v343_v34  ;;  %vm349_vm12 = vweird.f32 %v343_v34 }
 0x26e   :  { %v380_v43 = vadd.f32 1.0, %v706_v40  ;;  %v370_v61 = vmul.f32 1.442695, %v369_v56  ;;  %v577_v40 = vld [vmem:[#allocation2 + $0x50] sm:$0xf] }
 0x26f   :  { %v356_v49 = vor.u32 1.1754944e-38, %v355_v46  ;;  %vm354_vm15 = vcmp.eq.f32.partialorder %v353_v24, 8.507059e+37 }
 0x270   :  { %709 = vrcp.f32 %v380_v43  ;;  %v392_v7 = vand.u32 2147483648, %v380_v43  ;;  %vm386_vm2 = vweird.f32 %v380_v43  ;;  %v390_v9 = vand.u32 2147483647, %v380_v43 }
 0x271   :  { %711 = vpow2.f32 %v370_v61 }
 0x272   :  { %v393_v14 = vor.u32 1.1754944e-38, %v392_v7  ;;  %vm391_vm4 = vcmp.eq.f32.partialorder %v390_v9, 8.507059e+37 }
 0x273   :  { %v708_v41 = vpop.eup %707 }
 0x274   :  { %v345_v42 = vmul.f32 %v708_v41, %v343_v34  ;;  %vm350_vm10 = vweird.f32 %v708_v41 }
 0x275   :  { %vm351_vm14 = vmor %vm349_vm12, %vm350_vm10 }
 0x276   :  { %v346_v44 = vsub.f32 1.0, %v345_v42  ;;  %v710_v54 = vpop.eup %709  ;;  %v570_v42 = vld [vmem:[#allocation2 + $0x48] sm:$0xf] }
 0x277   :  { %v382_v59 = vmul.f32 %v710_v54, %v380_v43  ;;  %vm387_vm0 = vweird.f32 %v710_v54  ;;  %v712_v5 = vpop.eup %711 }
 0x278   :  { %v347_v47 = vmul.f32 %v708_v41, %v346_v44  ;;  %vm388_vm3 = vmor %vm386_vm2, %vm387_vm0  ;;  %vm650_vm0 = vcmask 156672  }
 0x279   :  { %v383_v63 = vsub.f32 1.0, %v382_v59 }
 0x27a   :  { %v348_v48 = vadd.f32 %v708_v41, %v347_v47 }
 0x27b   :  { %v384_v2 = vmul.f32 %v710_v54, %v383_v63 }
 0x27c   :  { %v352_v50 = vsel %vm351_vm14, %v708_v41, %v348_v48 }
 0x27d   :  { %v357_v52 = vsel %vm354_vm15, %v356_v49, %v352_v50  ;;  %v385_v4 = vadd.f32 %v710_v54, %v384_v2  ;;  %vm648_vm15 = vcmask 146432  }
 0x27e   :  { %v359_v53 = vmul.f32 1.0614054, %v357_v52 }
 0x27f   :  { %v389_v12 = vsel %vm388_vm3, %v710_v54, %v385_v4  ;;  %v471_v4 = vld [vmem:[#allocation2 + $0x18] sm:$0xf] }
 0x280   :  { %v360_v55 = vadd.f32 -1.4531521, %v359_v53  ;;  %v394_v17 = vsel %vm391_vm4, %v393_v14, %v389_v12 }
 0x281   :  { %v396_v16 = vmul.f32 %v394_v17, %v942_v21 }
 0x282   :  { %v361_v57 = vmul.f32 %v360_v55, %v357_v52 }
 0x284   :  { %v362_v60 = vadd.f32 1.4214138, %v361_v57 }
 0x286   :  { %v363_v62 = vmul.f32 %v362_v60, %v357_v52 }
 0x288   :  { %v364_v0 = vadd.f32 -0.28449672, %v363_v62 }
 0x28a   :  { %v365_v1 = vmul.f32 %v364_v0, %v357_v52 }
 0x28c   :  { %v366_v3 = vadd.f32 0.2548296, %v365_v1 }
 0x28e   :  { %v367_v45 = vmul.f32 %v366_v3, %v357_v52 }
 0x290   :  { %v372_v8 = vmul.f32 %v712_v5, %v367_v45 }
 0x292   :  { %v373_v11 = vsub.f32 1.0, %v372_v8  ;;  %v839_v8 = vmov -0.8  }
 0x293   :  { %v474_v9 = vsel %vm85_vm11, 1.2, %v839_v8 }
 0x294   :  { %v374_v15 = vmul.f32 %v373_v11, %v340_v13 }
 0x296   :  { %v375_v20 = vadd.f32 1.0, %v374_v15 }
 0x298   :  { %v376_v22 = vmul.f32 %v375_v20, %v337_v18 }
 0x29a   :  { %v397_v23 = vsel %vm85_vm11, %v376_v22, %v396_v16 }
 0x29b   :  { %446 = vmatmul.f32.vlgmr.msrb.gmra.mxu1 %v397_v23  ;;  %466 = vmatmul.f32.vlgmr.msrb.gmra.mxu2 %v397_v23 }
 0x2a2   :  { %v548_v19 = vpop.xlane.xlu2 %547 }
 0x2a3   :  { %v549_v25 = vsub.f32 %v936_v58, %v548_v19 }
 0x2a5   :  { %v550_v26 = vmul.f32 1.442695, %v549_v25 }
 0x2a7   :  { %713 = vpow2.f32 %v550_v26 }
 0x2ad   :  { %v714_v6 = vpop.eup %713 }
 0x2ae   :  { %v552_v27 = vsel %vm488_vm13, %v714_v6, 0.0 }
 0x2af   :  { %553 = vadd.xlane.f32.xlu0 %v552_v27 }
 0x318   :  { %v447_v3 = vpop.f32.mrf.mxu1 }
 0x31e   :  { %v467_v2 = vpop.f32.mrf.mxu2 }
 0x31f   :  { %v470_v45 = vsel %vm85_vm11, %v447_v3, %v467_v2  ;;  %vm644_vm11 = vcmask 64512  }
 0x320   :  { %v472_v5 = vadd.f32 %v471_v4, %v470_v45 }
 0x322   :  { %v554_v21 = vpop.xlane.xlu0 %553 }
 0x323   :  { %715 = vrcp.f32 %v554_v21  ;;  %v566_v34 = vand.u32 2147483648, %v554_v21  ;;  %v564_v58 = vand.u32 2147483647, %v554_v21  ;;  %vm560_vm6 = vweird.f32 %v554_v21 }
 0x325   :  { %v567_v37 = vor.u32 1.1754944e-38, %v566_v34  ;;  %vm565_vm8 = vcmp.eq.f32.partialorder %v564_v58, 8.507059e+37 }
 0x329   :  { %v716_v30 = vpop.eup %715 }
 0x32a   :  { %v556_v31 = vmul.f32 %v716_v30, %v554_v21  ;;  %vm561_vm5 = vweird.f32 %v716_v30 }
 0x32b   :  { %vm562_vm7 = vmor %vm560_vm6, %vm561_vm5 }
 0x32c   :  { %v557_v33 = vsub.f32 1.0, %v556_v31 }
 0x32e   :  { %v558_v35 = vmul.f32 %v716_v30, %v557_v33 }
 0x330   :  { %v559_v36 = vadd.f32 %v716_v30, %v558_v35 }
 0x332   :  { %v563_v38 = vsel %vm562_vm7, %v716_v30, %v559_v36 }
 0x333   :  { %v568_v32 = vsel %vm565_vm8, %v567_v37, %v563_v38 }
 0x334   :  { %v569_v39 = vmul.f32 %v714_v6, %v568_v32 }
 0x336   :  { %579 = vperm.xlu2 %682, %v569_v39   ;;  %573 = vperm.xlu1 %681, %v569_v39  }
 0x33e   :  { %684 = vset.pattern.permute.xlu2 %v838_v29 }
 0x390   :  { %v580_v41 = vpop.permute.xlu2 %579 }
 0x391   :  { %v582_v44 = vmul.f32 %v580_v41, %v577_v40 }
 0x3a8   :  { %v574_v43 = vpop.permute.xlu1 %573 }
 0x3a9   :  { %v576_v46 = vmul.f32 %v574_v43, %v570_v42 }
 0x3ab   :  { %v583_v47 = vadd.f32 %v582_v44, %v576_v46 }
 0x3ad   :  { %v584_v24 = vsel %vm488_vm13, %v583_v47, -inf }
 0x3ae   :  { %585 = vmax.xlane.f32.xlu0 %v584_v24 }
 0x421   :  { %v586_v48 = vpop.xlane.xlu0 %585 }
 0x422   :  { %v587_v49 = vsub.f32 %v583_v47, %v586_v48 }
 0x424   :  { %v588_v50 = vmul.f32 1.442695, %v587_v49 }
 0x426   :  { %717 = vpow2.f32 %v588_v50 }
 0x42c   :  { %v718_v51 = vpop.eup %717 }
 0x42d   :  { %v590_v52 = vsel %vm488_vm13, %v718_v51, 0.0  ;;  %vm646_vm13 = vcmask 130048  }
 0x42e   :  { %591 = vadd.xlane.f32.xlu0 %v590_v52 }
 0x4a1   :  { %v592_v53 = vpop.xlane.xlu0 %591 }
 0x4a2   :  { %719 = vrcp.f32 %v592_v53  ;;  %v604_v57 = vand.u32 2147483648, %v592_v53  ;;  %v602_v60 = vand.u32 2147483647, %v592_v53  ;;  %vm598_vm10 = vweird.f32 %v592_v53 }
 0x4a3   :  { %721 = vtanh.f32 %v472_v5 }
 0x4a4   :  { %v605_v62 = vor.u32 1.1754944e-38, %v604_v57  ;;  %vm603_vm14 = vcmp.eq.f32.partialorder %v602_v60, 8.507059e+37 }
 0x4a8   :  { %v720_v54 = vpop.eup %719 }
 0x4a9   :  { %v594_v55 = vmul.f32 %v720_v54, %v592_v53  ;;  %vm599_vm9 = vweird.f32 %v720_v54  ;;  %v722_v7 = vpop.eup %721 }
 0x4aa   :  { %vm600_vm12 = vmor %vm598_vm10, %vm599_vm9  ;;  %v475_v11 = vmul.f32 %v722_v7, %v474_v9 }
 0x4ab   :  { %v595_v56 = vsub.f32 1.0, %v594_v55 }
 0x4ac   :  { %v627_v12 = vperm.slane %v475_v11, 3  ;;  %v625_v14 = vperm.slane %v475_v11, 2  ;;  %v615_v23 = vperm.slane %v475_v11, 1  ;;  %v613_v25 = vperm.slane %v475_v11, 0 }
 0x4ad   :  { %v596_v59 = vmul.f32 %v720_v54, %v595_v56 }
 0x4af   :  { %v597_v61 = vadd.f32 %v720_v54, %v596_v59 }
 0x4b1   :  { %v601_v63 = vsel %vm600_vm12, %v720_v54, %v597_v61 }
 0x4b2   :  { %v606_v0 = vsel %vm603_vm14, %v605_v62, %v601_v63 }
 0x4b3   :  { %v607_v1 = vmul.f32 %v718_v51, %v606_v0 }
 0x4b5   :  { %610 = vperm.xlu2 %684, %v607_v1   ;;  %622 = vperm.xlu0 %683, %v607_v1   ;;  %v640_v22 = vrot.slane %v607_v1, 2 }
 0x4bd   :  { %637 = vrot.lane.b32.xlu2 %v607_v1, %s833_s14 }
 0x50f   :  { %v611_v16 = vpop.permute.xlu2 %610 }
 0x510   :  { %v616_v19 = vmul.f32 %v615_v23, %v611_v16  ;;  %v614_v6 = vmul.f32 %v613_v25, %v611_v16 }
 0x512   :  { %v618_v26 = vrot.slane %v616_v19, 2 }
 0x514   :  { %v620_v27 = vadd.f32 %v618_v26, %v614_v6 }
 0x517   :  { %v638_v29 = vpop.permute.xlu2 %637 }
 0x527   :  { %v623_v13 = vpop.permute.xlu0 %622 }
 0x528   :  { %v628_v15 = vmul.f32 %v627_v12, %v623_v13  ;;  %v626_v17 = vmul.f32 %v625_v14, %v623_v13 }
 0x52a   :  { %v630_v18 = vrot.slane %v628_v15, 2 }
 0x52c   :  { %v632_v20 = vadd.f32 %v630_v18, %v626_v17 }
 0x52e   :  { %634 = vrot.lane.b32.xlu1 %v632_v20, %s830_s6 }
 0x536   :  { %641 = vrot.lane.b32.xlu1 %v640_v22, %s840_s0 }
 0x5a0   :  { %v635_v10 = vpop.permute.xlu1 %634 }
 0x5a1   :  { %v645_v28 = vsel %vm644_vm11, %v620_v27, %v635_v10 }
 0x5a2   :  { %v647_v21 = vsel %vm646_vm13, %v645_v28, %v638_v29 }
 0x5a8   :  { %v642_v30 = vpop.permute.xlu1 %641 }
 0x5a9   :  { %v649_v31 = vsel %vm648_vm15, %v647_v21, %v642_v30 }
 0x5aa   :  { %651 = vst.msk [vmem:[%s973_s5] sm:$0x3] %vm650_vm0, %v649_v31 }
 0x5ab   :  { %656 = vsyncpa [#allocation3], 1 }
 0x5ac   :  { %657 = vsyncpa [#allocation5], 1 }
 0x5ad   :  { %658 = vsyncpa [#allocation8], 1 }

</bundles_post_ra>
